<compile_context>
chip_gen: v7x
topology: tpu7x:2x2x1
jax: 0.10.0
libtpu: 0.0.40
codegen_flags: <defaults>
</compile_context>

<pallas_src>
import jax
import jax.numpy as jnp
from jax.experimental import pallas as pl
from jax.experimental.pallas import tpu as pltpu


def _round_up(x, m):
    return (x + m - 1) // m * m


def geglu_kernel(x_ref, wx_ref, wg_ref, bx_ref, bg_ref, o_ref):
    # x_ref: [tm, dim_p]   wx_ref/wg_ref: [dim_p, tn]   bx_ref/bg_ref: [1, tn]   o_ref: [tm, tn]
    x = x_ref[...]
    x_part = jnp.dot(x, wx_ref[...], preferred_element_type=jnp.float32) + bx_ref[...]
    gate = jnp.dot(x, wg_ref[...], preferred_element_type=jnp.float32) + bg_ref[...]
    # sigmoid(gate) = 1 / (1 + exp(-gate)); exp and approx reciprocal both go to the EUP slot.
    sig = pl.reciprocal(1.0 + jnp.exp(-gate), approx=True)
    o_ref[...] = (x_part * sig).astype(o_ref.dtype)


def geglu_pallas(x, w_t, b, *, tm=256, tn=256, use_bf16=True,
                 vmem_limit_bytes=48 * 1024 * 1024):
    """GeGLU forward.

    x   : [..., dim]
    w_t : [dim, 2*dim]   (transposed PyTorch nn.Linear weight)
    b   : [2*dim]
    """
    dim = x.shape[-1]
    lead = x.shape[:-1]
    out_dtype = x.dtype

    x2d = x.reshape(-1, dim)
    M = x2d.shape[0]

    # Split the projection into the x-half and the gate-half.
    w_x = w_t[:, :dim]
    w_g = w_t[:, dim:]
    b_x = b[:dim].astype(jnp.float32)
    b_g = b[dim:].astype(jnp.float32)

    # --- padding / tile selection -------------------------------------------------
    # Output-lane axis: pad to a multiple of 128 so output stores are lane-dense.
    tn = min(tn, _round_up(dim, 128))
    dim_p = _round_up(dim, tn)          # multiple of tn (and of 128)
    # Row axis: don't over-pad tiny inputs; keep the tile a multiple of 8.
    tm = min(tm, _round_up(M, 8))
    m_p = _round_up(M, tm)

    compute_dtype = jnp.bfloat16 if use_bf16 else x.dtype
    x2d = x2d.astype(compute_dtype)
    w_x = w_x.astype(compute_dtype)
    w_g = w_g.astype(compute_dtype)

    # Zero-pad (zeros contribute nothing to the matmul; padded rows/cols are sliced off).
    x2d = jnp.pad(x2d, ((0, m_p - M), (0, dim_p - dim)))
    w_x = jnp.pad(w_x, ((0, dim_p - dim), (0, dim_p - dim)))
    w_g = jnp.pad(w_g, ((0, dim_p - dim), (0, dim_p - dim)))
    b_x = jnp.pad(b_x, (0, dim_p - dim)).reshape(1, dim_p)
    b_g = jnp.pad(b_g, (0, dim_p - dim)).reshape(1, dim_p)

    grid = (m_p // tm, dim_p // tn)
    itemsize = jnp.dtype(compute_dtype).itemsize
    cost = pl.CostEstimate(
        flops=2 * m_p * dim_p * (2 * dim_p),
        transcendentals=m_p * dim_p,
        bytes_accessed=(m_p * dim_p * itemsize            # activations
                        + 2 * dim_p * dim_p * itemsize    # both weight halves
                        + 2 * dim_p * 4                   # biases (f32)
                        + m_p * dim_p * jnp.dtype(out_dtype).itemsize),
    )

    out2d = pl.pallas_call(
        geglu_kernel,
        out_shape=jax.ShapeDtypeStruct((m_p, dim_p), out_dtype),
        grid_spec=pltpu.PrefetchScalarGridSpec(
            num_scalar_prefetch=0,
            grid=grid,
            in_specs=[
                pl.BlockSpec((tm, dim_p), lambda i, j: (i, 0)),    # activation row tile (full K)
                pl.BlockSpec((dim_p, tn), lambda i, j: (0, j)),    # w_x column slice
                pl.BlockSpec((dim_p, tn), lambda i, j: (0, j)),    # w_gate column slice
                pl.BlockSpec((1, tn), lambda i, j: (0, j)),        # bias (x half)
                pl.BlockSpec((1, tn), lambda i, j: (0, j)),        # bias (gate half)
            ],
            out_specs=pl.BlockSpec((tm, tn), lambda i, j: (i, j)),
        ),
        compiler_params=pltpu.CompilerParams(
            dimension_semantics=("parallel", "parallel"),
            vmem_limit_bytes=vmem_limit_bytes,
        ),
        cost_estimate=cost,
    )(x2d, w_x, w_g, b_x, b_g)

    return out2d[:M, :dim].reshape(*lead, dim)


def geglu_ref(x, w_t, b, *, use_bf16=True):
    # Matched-precision reference: bf16 operands, f32 accumulation (same as the kernel).
    compute_dtype = jnp.bfloat16 if use_bf16 else x.dtype
    xc = x.astype(compute_dtype)
    wc = w_t.astype(compute_dtype)
    y = jnp.einsum("...d,de->...e", xc, wc,
                   preferred_element_type=jnp.float32) + b.astype(jnp.float32)
    d = x.shape[-1]
    return (y[..., :d] * jax.nn.sigmoid(y[..., d:])).astype(x.dtype)


if __name__ == "__main__":
    key = jax.random.PRNGKey(0)
    batch, seq, dim = 2, 8, 32
    kx, kw, kb = jax.random.split(key, 3)

    x = jax.random.normal(kx, (batch, seq, dim), dtype=jnp.float32)
    # nn.Linear(dim, 2*dim): weight [2*dim, dim], bias [2*dim]; wrapper takes weight.T
    w = jax.random.normal(kw, (2 * dim, dim), dtype=jnp.float32) * (1.0 / jnp.sqrt(dim))
    b = jax.random.normal(kb, (2 * dim,), dtype=jnp.float32) * 0.1
    w_t = w.T

    # dropout(p=0.0) / eval mode => identity, so no masking is applied.
    out = geglu_pallas(x, w_t, b)
    out = jax.block_until_ready(out)

    ref = geglu_ref(x, w_t, b)
    assert out.shape == (batch, seq, dim)
    assert jnp.allclose(out, ref, atol=2e-2, rtol=2e-2), float(jnp.max(jnp.abs(out - ref)))
    print("KERNEL_OK")
</pallas_src>

<mosaic_0001>
module attributes {stable_mosaic.version = 11 : i64} {
  func.func @geglu_kernel(%arg0: i32, %arg1: i32, %arg2: memref<16x128xbf16, #tpu.memory_space<vmem>>, %arg3: memref<128x128xbf16, #tpu.memory_space<vmem>>, %arg4: memref<128x128xbf16, #tpu.memory_space<vmem>>, %arg5: memref<1x128xf32, #tpu.memory_space<vmem>>, %arg6: memref<1x128xf32, #tpu.memory_space<vmem>>, %arg7: memref<16x128xf32, #tpu.memory_space<vmem>>) attributes {dimension_semantics = [#tpu.dimension_semantics<parallel>, #tpu.dimension_semantics<parallel>], iteration_bounds = array<i64: 1, 1>, scalar_prefetch = 0 : i64, scratch_operands = 0 : i64, tpu.core_type = #tpu.core_type<tc>, window_params = [{transform_indices = @transform_0, window_bounds = array<i64: 16, 128>}, {transform_indices = @transform_1, window_bounds = array<i64: 128, 128>}, {transform_indices = @transform_2, window_bounds = array<i64: 128, 128>}, {transform_indices = @transform_3, window_bounds = array<i64: 1, 128>}, {transform_indices = @transform_4, window_bounds = array<i64: 1, 128>}, {transform_indices = @transform_5, window_bounds = array<i64: 16, 128>}]} {
    %c0 = arith.constant 0 : index
    %c0_0 = arith.constant 0 : index
    %0 = vector.load %arg2[%c0, %c0_0] : memref<16x128xbf16, #tpu.memory_space<vmem>>, vector<16x128xbf16>
    %c0_1 = arith.constant 0 : index
    %c0_2 = arith.constant 0 : index
    %1 = vector.load %arg3[%c0_1, %c0_2] : memref<128x128xbf16, #tpu.memory_space<vmem>>, vector<128x128xbf16>
    %cst = arith.constant dense<0.000000e+00> : vector<16x128xf32>
    %2 = tpu.matmul %0, %1, %cst {dimension_numbers = #tpu.dot_dimension_numbers<[1], [0], [0], [1], [0, 0, 1, 1], [], []>} : vector<16x128xbf16>, vector<128x128xbf16>, vector<16x128xf32> -> vector<16x128xf32>
    %c0_3 = arith.constant 0 : index
    %c0_4 = arith.constant 0 : index
    %3 = vector.load %arg5[%c0_3, %c0_4] : memref<1x128xf32, #tpu.memory_space<vmem>>, vector<1x128xf32>
    %4 = vector.broadcast %3 : vector<1x128xf32> to vector<16x128xf32>
    %5 = arith.addf %2, %4 : vector<16x128xf32>
    %c0_5 = arith.constant 0 : index
    %c0_6 = arith.constant 0 : index
    %6 = vector.load %arg4[%c0_5, %c0_6] : memref<128x128xbf16, #tpu.memory_space<vmem>>, vector<128x128xbf16>
    %cst_7 = arith.constant dense<0.000000e+00> : vector<16x128xf32>
    %7 = tpu.matmul %0, %6, %cst_7 {dimension_numbers = #tpu.dot_dimension_numbers<[1], [0], [0], [1], [0, 0, 1, 1], [], []>} : vector<16x128xbf16>, vector<128x128xbf16>, vector<16x128xf32> -> vector<16x128xf32>
    %c0_8 = arith.constant 0 : index
    %c0_9 = arith.constant 0 : index
    %8 = vector.load %arg6[%c0_8, %c0_9] : memref<1x128xf32, #tpu.memory_space<vmem>>, vector<1x128xf32>
    %9 = vector.broadcast %8 : vector<1x128xf32> to vector<16x128xf32>
    %10 = arith.addf %7, %9 : vector<16x128xf32>
    %cst_10 = arith.constant 0.000000e+00 : f32
    %11 = vector.broadcast %cst_10 : f32 to vector<16x128xf32>
    %12 = arith.subf %11, %10 : vector<16x128xf32>
    %13 = math.exp %12 : vector<16x128xf32>
    %cst_11 = arith.constant 1.000000e+00 : f32
    %14 = vector.broadcast %cst_11 : f32 to vector<16x128xf32>
    %15 = arith.addf %14, %13 : vector<16x128xf32>
    %16 = tpu.reciprocal %15 {approx = true} : vector<16x128xf32> -> vector<16x128xf32>
    %17 = arith.mulf %5, %16 : vector<16x128xf32>
    %c0_12 = arith.constant 0 : index
    %c0_13 = arith.constant 0 : index
    %18 = vector.load %arg7[%c0_12, %c0_13] : memref<16x128xf32, #tpu.memory_space<vmem>>, vector<16x128xf32>
    tpu.vector_store %arg7[%c0_12, %c0_13], %17 {strides = array<i32>} : memref<16x128xf32, #tpu.memory_space<vmem>>, vector<16x128xf32>,
    return
  }
  func.func @transform_0(%arg0: i32, %arg1: i32) -> (i32, i32) {
    %c0_i32 = arith.constant 0 : i32
    %c0_i32_0 = arith.constant 0 : i32
    return %arg0, %c0_i32 : i32, i32
  }
  func.func @transform_1(%arg0: i32, %arg1: i32) -> (i32, i32) {
    %c0_i32 = arith.constant 0 : i32
    %c0_i32_0 = arith.constant 0 : i32
    return %c0_i32, %arg1 : i32, i32
  }
  func.func @transform_2(%arg0: i32, %arg1: i32) -> (i32, i32) {
    %c0_i32 = arith.constant 0 : i32
    %c0_i32_0 = arith.constant 0 : i32
    return %c0_i32, %arg1 : i32, i32
  }
  func.func @transform_3(%arg0: i32, %arg1: i32) -> (i32, i32) {
    %c0_i32 = arith.constant 0 : i32
    %c0_i32_0 = arith.constant 0 : i32
    return %c0_i32, %arg1 : i32, i32
  }
  func.func @transform_4(%arg0: i32, %arg1: i32) -> (i32, i32) {
    %c0_i32 = arith.constant 0 : i32
    %c0_i32_0 = arith.constant 0 : i32
    return %c0_i32, %arg1 : i32, i32
  }
  func.func @transform_5(%arg0: i32, %arg1: i32) -> (i32, i32) {
    %c0_i32 = arith.constant 0 : i32
    return %arg0, %arg1 : i32, i32
  }
}

</mosaic_0001>

<bundles_post_ra>
// kernel: tpu_custom_call.1
= control target key start
LH: loop header
LB: loop body
LE: loop exit
PB: predicated region body
PF: predicated region fallthrough
CT: control target
= control target key end

     0   :  { %10 = vsyncpa [#allocation3], 0  ;;  %s643_s0 = inlined_call_operand.hbm [shape: bf16[16,128], index: 0, kind: input, shape index: {}]   ;;  %s644_s1 = inlined_call_operand.hbm [shape: bf16[128,128], index: 1, kind: input, shape index: {}]   ;;  %s645_s2 = inlined_call_operand.hbm [shape: bf16[128,128], index: 2, kind: input, shape index: {}]   ;;  %s646_s3 = inlined_call_operand.vmem [shape: f32[1,128], index: 3, kind: input, shape index: {}]   ;;  %s647_s4 = inlined_call_operand.vmem [shape: f32[1,128], index: 4, kind: input, shape index: {}]   ;;  %s648_s5 = inlined_call_operand.hbm [shape: f32[16,128], index: 5, kind: output, shape index: {}]  }
   0x1   :  { %11 = vsyncpa [#allocation6], 0 }
   0x2   :  { %12 = vsyncpa [#allocation4], 0  ;;  %s533_s18 = smov [#allocation5]   ;;  %s534_s20 = smov [#allocation2]  }
   0x3   :  { %s30_s19 = sshll.u32 %s533_s18, 4  ;;  %s18_s21 = sshll.u32 %s534_s20, 4  ;;  %s31_s19 = int_to_ptr.vmem [resolvable:$true] %s30_s19  ;;  %s573_s21 = int_to_ptr.vmem [resolvable:$true] %s18_s21 }
   0x4   :  { %s439_s24 = scalar_lea.hbm %s644_s1, 1024 }
   0x5   :  { %p440_p0 = scmp.ne.s32.totalorder %s644_s1, %s439_s24  ;;  %p443_p1 = scmp.lt.u32.totalorder %s439_s24, %s644_s1 }
   0x7   :  { %p445_p2 = pnand %p443_p1, %p440_p0 }
   0x9   :  { %448 = shalt.err (!%p445_p2)
}
   0xa   :  { %s449_s29 = scalar_lea.vmem %s31_s19, 1024  ;;  %p454_p4 = scmp.lt.s32.totalorder %s31_s19, %s31_s19 }
   0xb   :  { %p450_p3 = scmp.ne.s32.totalorder %s31_s19, %s449_s29  ;;  %p455_p5 = scmp.lt.s32.totalorder %s449_s29, %s449_s29 }
   0xd   :  { %p456_p6 = por %p455_p5, %p454_p4 }
   0xf   :  { %p457_p7 = pnand %p456_p6, %p450_p3 }
  0x11   :  { %460 = shalt.err (!%p457_p7)
}
  0x12   :  { %s535_s30 = smov 64   ;;  %s536_s6 = smov 4  }
  0x13   :  { %36 = dma.hbm_to_vmem [thread:$0]  %s644_s1, 1024, %s31_s19, [#allocation6], %s535_s30, %s535_s30, %s536_s6  }
  0x14   :  { %s461_s11 = scalar_lea.hbm %s643_s0, 128 }
  0x15   :  { %p462_p8 = scmp.ne.s32.totalorder %s643_s0, %s461_s11  ;;  %p465_p9 = scmp.lt.u32.totalorder %s461_s11, %s643_s0 }
  0x17   :  { %p467_p10 = pnand %p465_p9, %p462_p8 }
  0x19   :  { %470 = shalt.err (!%p467_p10)
}
  0x1a   :  { %s471_s16 = scalar_lea.vmem %s573_s21, 128  ;;  %p476_p12 = scmp.lt.s32.totalorder %s573_s21, %s573_s21 }
  0x1b   :  { %p472_p11 = scmp.ne.s32.totalorder %s573_s21, %s471_s16  ;;  %p477_p13 = scmp.lt.s32.totalorder %s471_s16, %s471_s16 }
  0x1d   :  { %p478_p0 = por %p477_p13, %p476_p12 }
  0x1f   :  { %p479_p1 = pnand %p478_p0, %p472_p11 }
  0x21   :  { %482 = shalt.err (!%p479_p1)
}
  0x22   :  { %24 = dma.hbm_to_vmem [thread:$0]  %s643_s0, 128, %s573_s21, [#allocation3], %s535_s30, %s535_s30, %s536_s6  }
  0x23   :  { %s537_s18 = smov [#allocation7]   ;;  %s483_s23 = scalar_lea.hbm %s645_s2, 1024 }
  0x24   :  { %s42_s19 = sshll.u32 %s537_s18, 4  ;;  %p484_p2 = scmp.ne.s32.totalorder %s645_s2, %s483_s23  ;;  %s43_s19 = int_to_ptr.vmem [resolvable:$true] %s42_s19 }
  0x25   :  { %p487_p3 = scmp.lt.u32.totalorder %s483_s23, %s645_s2 }
  0x27   :  { %p489_p4 = pnand %p487_p3, %p484_p2 }
  0x29   :  { %492 = shalt.err (!%p489_p4)
}
  0x2a   :  { %s493_s28 = scalar_lea.vmem %s43_s19, 1024  ;;  %p498_p6 = scmp.lt.s32.totalorder %s43_s19, %s43_s19 }
  0x2b   :  { %p494_p5 = scmp.ne.s32.totalorder %s43_s19, %s493_s28  ;;  %p499_p7 = scmp.lt.s32.totalorder %s493_s28, %s493_s28 }
  0x2d   :  { %p500_p8 = por %p499_p7, %p498_p6 }
  0x2f   :  { %p501_p9 = pnand %p500_p8, %p494_p5 }
  0x31   :  { %504 = shalt.err (!%p501_p9)
}
  0x32   :  { %48 = dma.hbm_to_vmem [thread:$0]  %s645_s2, 1024, %s43_s19, [#allocation6], %s535_s30, %s535_s30, %s536_s6  }
  0x33   :  { %527 = dma.done.wait [#allocation3], 128  }
  0x34   :  { %528 = vsyncadd [#allocation3], 4294967168 }
  0x35   :  { %529 = dma.done.wait [#allocation6], 2048  }
  0x36   :  { %530 = vsyncadd [#allocation6], 4294965248  ;;  %v538_v0 = vmov 0.0   ;;  %vm539_vm0 = vmmov 0   ;;  %v414_v1 = vld [vmem:[#allocation7] sm:$0xff]   ;;  %v415_v2 = vld [vmem:[#allocation7 + $0x8] sm:$0xff]  }
  0x37   :  { %384 = vmatprep.subr.bf16.mxu1 %v538_v0  ;;  %364 = vmatprep.subr.bf16.mxu0 %v538_v0  ;;  %v416_v3 = vld [vmem:[#allocation7 + $0x10] sm:$0xff]   ;;  %v421_v4 = vld [vmem:[#allocation5] sm:$0xff]   ;;  %v423_v5 = vld [vmem:[#allocation5 + $0x8] sm:$0xff]   ;;  %s540_s6 = smov [#allocation8]  }
  0x38   :  { %400 = vmatprep.mubr.msk.bf16.mxu1 %vm539_vm0, %v538_v0  ;;  %380 = vmatprep.mubr.msk.bf16.mxu0 %vm539_vm0, %v538_v0  ;;  %v417_v6 = vld [vmem:[#allocation7 + $0x18] sm:$0xff]   ;;  %v425_v7 = vld [vmem:[#allocation5 + $0x10] sm:$0xff]   ;;  %v418_v8 = vld [vmem:[#allocation7 + $0x20] sm:$0xff]   ;;  %s314_s7 = sshll.u32 %s540_s6, 4  ;;  %s315_s7 = int_to_ptr.vmem [resolvable:$true] %s314_s7 }
  0x39   :  { %385 = vmatpush3.bf16.msra.mxu1 %v414_v1  ;;  %365 = vmatpush3.bf16.msra.mxu0 %v421_v4  ;;  %v426_v9 = vld [vmem:[#allocation5 + $0x18] sm:$0xff]   ;;  %v419_v10 = vld [vmem:[#allocation7 + $0x28] sm:$0xff]   ;;  %v427_v11 = vld [vmem:[#allocation5 + $0x20] sm:$0xff]   ;;  %s505_s8 = scalar_lea.vmem %s315_s7, 256  ;;  %p510_p11 = scmp.lt.s32.totalorder %s315_s7, %s315_s7 }
  0x3a   :  { %386 = vmatprep.subr.bf16.mxu1 %v538_v0  ;;  %366 = vmatprep.subr.bf16.mxu0 %v538_v0  ;;  %v420_v12 = vld [vmem:[#allocation7 + $0x30] sm:$0xff]   ;;  %v428_v13 = vld [vmem:[#allocation5 + $0x28] sm:$0xff]   ;;  %v422_v14 = vld [vmem:[#allocation7 + $0x38] sm:$0xff]   ;;  %p506_p10 = scmp.ne.s32.totalorder %s315_s7, %s505_s8  ;;  %p511_p12 = scmp.lt.s32.totalorder %s505_s8, %s505_s8 }
  0x3b   :  { %v424_v15 = vld [vmem:[#allocation2] sm:$0xff]   ;;  %v429_v16 = vld [vmem:[#allocation5 + $0x30] sm:$0xff]  }
  0x3c   :  { %v430_v17 = vld [vmem:[#allocation5 + $0x38] sm:$0xff]   ;;  %p512_p13 = por %p511_p12, %p510_p11 }
  0x3d   :  { %387 = vmatpush3.bf16.msra.mxu1 %v415_v2  ;;  %367 = vmatpush3.bf16.msra.mxu0 %v423_v5  ;;  %v337_v18 = vld [vmem:[%s647_s4] ss:$0 sm:$0xff] }
  0x3e   :  { %388 = vmatprep.subr.bf16.mxu1 %v538_v0  ;;  %368 = vmatprep.subr.bf16.mxu0 %v538_v0  ;;  %v327_v37 = vld [vmem:[%s646_s3] ss:$0 sm:$0xff]  ;;  %p513_p0 = pnand %p512_p13, %p506_p10 }
  0x41   :  { %389 = vmatpush3.bf16.msra.mxu1 %v416_v3  ;;  %369 = vmatpush3.bf16.msra.mxu0 %v425_v7 }
  0x42   :  { %390 = vmatprep.subr.bf16.mxu1 %v538_v0  ;;  %370 = vmatprep.subr.bf16.mxu0 %v538_v0 }
  0x45   :  { %391 = vmatpush3.bf16.msra.mxu1 %v417_v6  ;;  %371 = vmatpush3.bf16.msra.mxu0 %v426_v9 }
  0x46   :  { %392 = vmatprep.subr.bf16.mxu1 %v538_v0  ;;  %372 = vmatprep.subr.bf16.mxu0 %v538_v0 }
  0x49   :  { %393 = vmatpush3.bf16.msra.mxu1 %v418_v8  ;;  %373 = vmatpush3.bf16.msra.mxu0 %v427_v11 }
  0x4a   :  { %394 = vmatprep.subr.bf16.mxu1 %v538_v0  ;;  %374 = vmatprep.subr.bf16.mxu0 %v538_v0 }
  0x4d   :  { %395 = vmatpush3.bf16.msra.mxu1 %v419_v10  ;;  %375 = vmatpush3.bf16.msra.mxu0 %v428_v13 }
  0x4e   :  { %396 = vmatprep.subr.bf16.mxu1 %v538_v0  ;;  %376 = vmatprep.subr.bf16.mxu0 %v538_v0 }
  0x51   :  { %397 = vmatpush3.bf16.msra.mxu1 %v420_v12  ;;  %377 = vmatpush3.bf16.msra.mxu0 %v429_v16 }
  0x52   :  { %398 = vmatprep.subr.bf16.mxu1 %v538_v0  ;;  %378 = vmatprep.subr.bf16.mxu0 %v538_v0 }
  0x55   :  { %399 = vmatpush3.bf16.msra.mxu1 %v422_v14  ;;  %379 = vmatpush3.bf16.msra.mxu0 %v430_v17 }
  0x58   :  { %401 = vmatmul.mubr.bf16.vlgmr.msra.gmra.mrb[0].mxu1 %v424_v15  ;;  %381 = vmatmul.mubr.bf16.vlgmr.msra.gmra.mrb[0].mxu0 %v424_v15 }
 0x12b   :  { %v288_v19 = vpop.f32.mrb[0].mxu1  ;;  %v176_v29 = vpop.f32.mrb[0].mxu0 }
 0x12c   :  { %v289_v20 = vadd.f32 %v337_v18, %v288_v19  ;;  %v402_v21 = vpop.f32.mrb[1].mxu1  ;;  %v382_v30 = vpop.f32.mrb[1].mxu0  ;;  %v177_v38 = vadd.f32 %v327_v37, %v176_v29 }
 0x12d   :  { %v291_v22 = vpop.f32.mrb[2].mxu1  ;;  %v179_v31 = vpop.f32.mrb[2].mxu0 }
 0x12e   :  { %v295_v23 = vsub.f32 0.0, %v289_v20  ;;  %v292_v24 = vadd.f32 %v337_v18, %v291_v22  ;;  %v403_v25 = vpop.f32.mrb[3].mxu1  ;;  %v383_v32 = vpop.f32.mrb[3].mxu0  ;;  %v180_v41 = vadd.f32 %v327_v37, %v179_v31 }
 0x130   :  { %v297_v26 = vmul.f32 1.442695, %v295_v23  ;;  %v296_v27 = vsub.f32 0.0, %v292_v24 }
 0x132   :  { %431 = vpow2.f32 %v297_v26  ;;  %v299_v28 = vmul.f32 1.442695, %v296_v27 }
 0x134   :  { %433 = vpow2.f32 %v299_v28 }
 0x13c   :  { %v432_v33 = vpop.eup %431 }
 0x13d   :  { %v301_v34 = vadd.f32 1.0, %v432_v33 }
 0x13e   :  { %v434_v35 = vpop.eup %433 }
 0x13f   :  { %435 = vrcp.f32 %v301_v34  ;;  %v302_v36 = vadd.f32 1.0, %v434_v35 }
 0x141   :  { %437 = vrcp.f32 %v302_v36 }
 0x149   :  { %v436_v39 = vpop.eup %435 }
 0x14a   :  { %v305_v40 = vmul.f32 %v436_v39, %v177_v38 }
 0x14b   :  { %v438_v42 = vpop.eup %437 }
 0x14c   :  { %307 = vst [vmem:[#allocation8] sm:$0xff] %v305_v40  ;;  %v306_v43 = vmul.f32 %v438_v42, %v180_v41 }
 0x14e   :  { %308 = vst [vmem:[#allocation8 + $0x8] sm:$0xff] %v306_v43 }
 0x14f   :  { %516 = shalt.err (!%p513_p0)
}
 0x150   :  { %s517_s10 = scalar_lea.hbm %s648_s5, 256 }
 0x151   :  { %p518_p1 = scmp.ne.s32.totalorder %s648_s5, %s517_s10  ;;  %p521_p2 = scmp.lt.u32.totalorder %s517_s10, %s648_s5 }
 0x153   :  { %p523_p3 = pnand %p521_p2, %p518_p1 }
 0x155   :  { %526 = shalt.err (!%p523_p3)
}
 0x156   :  { %s541_s15 = smov 128   ;;  %s542_s16 = smov 8  }
 0x157   :  { %320 = dma.vmem_to_hbm [thread:$0]  %s315_s7, 256, %s648_s5, [#allocation4], %s541_s15, %s541_s15, %s542_s16  }
 0x158   :  { %531 = dma.done.wait [#allocation4], 256  }
 0x159   :  { %532 = vsyncadd [#allocation4], 4294967040 }
 0x15a   :  { %324 = vsyncpa [#allocation3], 1 }
 0x15b   :  { %325 = vsyncpa [#allocation6], 1 }
 0x15c   :  { %326 = vsyncpa [#allocation4], 1 }

</bundles_post_ra>
